<compile_context>
chip_gen: v6e
topology: v6e:2x2x1
jax: 0.10.0
libtpu: 0.0.40
codegen_flags: <defaults>
</compile_context>

<pallas_src>
import jax
import jax.numpy as jnp
from jax.experimental import pallas as pl
from jax.experimental.pallas import tpu as pltpu

_LANE = 128


def _round_up(x, m):
    return ((x + m - 1) // m) * m


def fused_net_kernel(ids_ref, t_ref, o_ref):
    # ids_ref : (L, tB) int32  token ids, batch on the LANE axis (lane-dense I/O)
    # t_ref   : (V, L)  f32    folded table T[v, l]; fused bias pre-added to column l=0
    # o_ref   : (1, tB) f32    sigmoid output row (lane-dense, unmasked stores)
    L = ids_ref.shape[0]
    V = t_ref.shape[0]

    t = t_ref[...]                                                  # (V, L), tiny, resident
    # In-kernel sublane iota over the vocab axis: exact integer one-hot, no MXU broadcast,
    # no float-equality hazard, and one fewer resident VMEM operand / DMA stream.
    iota_v = jax.lax.broadcasted_iota(jnp.int32, (V, 1), 0)         # (V, 1)

    acc = None
    for l in range(L):                                              # static unroll, L is small
        # one-hot + table lookup fused into a single select (compare + where: 2 VPU ops/elem)
        eq = ids_ref[l:l + 1, :] == iota_v                          # (V, tB) bool
        contrib = jnp.where(eq, t[:, l:l + 1], 0.0)                 # (V, tB) f32
        acc = contrib if acc is None else acc + contrib

    logit = jnp.sum(acc, axis=0, keepdims=True)                     # (1, tB) sublane reduce
    # Epilogue in f32 (v5e has no bf16 VPU/EUP).
    o_ref[...] = jax.nn.sigmoid(logit).astype(o_ref.dtype)


def net_forward(token_ids, emb_table, w1, b1, w2, b2):
    """Eval-mode forward pass of `Net`, fully fused into a single Pallas call.

    Weights are stored (in_features, out_features): w1 (L*E, 100), b1 (100,),
    w2 (100, 1), b2 (1,).
    """
    B, L = token_ids.shape
    V, E = emb_table.shape
    d_in = w1.shape[0]
    assert d_in == L * E, "Linear in_features must equal embedding_dim * max_string_length"

    # ---- one-time inference parameter folding (plain JAX, exact math, high precision) ----
    hp = jax.lax.Precision.HIGHEST
    w_fused = jnp.dot(w1, w2, precision=hp)                         # (d_in, 1)
    b_fused = (jnp.dot(b1, w2, precision=hp) + b2)[0]               # scalar
    t_vl = jnp.dot(emb_table, w_fused.reshape(L, E).T, precision=hp)    # (V, L): T[v, l]
    # Fold the bias into the l=0 column: every row takes exactly one entry from that column,
    # so this adds b_fused exactly once per row (no per-lane rounding).
    t_vl = t_vl.at[:, 0].add(b_fused).astype(jnp.float32)

    # ---- batch tiling: batch on the LANE axis, generation-aware tile cap ----
    # Budget ~4 live (V, tB) f32 temporaries + double-buffered ids/output blocks under a
    # conservative 8 MiB (fits v5e's 16 MiB default scoped VMEM; trivially fits v6e/v7x).
    vmem_budget = 8 << 20
    bytes_per_batch_col = 16 * V + 8 * L + 8
    cap = max(_LANE, min(4096, (vmem_budget // bytes_per_batch_col) // _LANE * _LANE))

    tB = min(cap, _round_up(B, _LANE))
    n_blocks = pl.cdiv(B, tB)
    if n_blocks > 1 and n_blocks % 2 == 1:
        n_blocks += 1            # even block count keeps v7x's two TensorCores balanced
    B_pad = n_blocks * tB

    ids = token_ids.astype(jnp.int32)
    if B_pad != B:
        ids = jnp.pad(ids, ((0, B_pad - B), (0, 0)))   # id 0 is in-range; rows sliced off below
    ids_t = ids.T                                       # (L, B_pad): batch -> lanes

    out = pl.pallas_call(
        fused_net_kernel,
        out_shape=jax.ShapeDtypeStruct((1, B_pad), jnp.float32),
        grid=(n_blocks,),
        in_specs=[
            pl.BlockSpec((L, tB), lambda i: (0, i)),    # ids: pipelined lane-dense batch tiles
            pl.BlockSpec((V, L), lambda i: (0, 0)),     # folded table: resident across the grid
        ],
        out_specs=pl.BlockSpec((1, tB), lambda i: (0, i)),   # lane-dense output row
        compiler_params=pltpu.CompilerParams(
            dimension_semantics=("parallel",),          # shard batch tiles across TCs (v7x)
        ),
    )(ids_t, t_vl)
    return out[0, :B].reshape(B, 1)


if __name__ == "__main__":
    # Small, module-consistent shapes.
    batch = 8
    embedding_dim = 16
    max_index = 32
    max_string_length = 8
    d_in = embedding_dim * max_string_length   # 128
    hidden = 100

    key = jax.random.PRNGKey(0)
    k_emb, k_w1, k_b1, k_w2, k_b2, k_tok = jax.random.split(key, 6)

    # Deterministic parameters (shapes match the PyTorch module; weights stored (in, out)).
    emb_table = jax.random.normal(k_emb, (max_index, embedding_dim), jnp.float32)
    lim1 = 1.0 / (d_in ** 0.5)
    w1 = jax.random.uniform(k_w1, (d_in, hidden), jnp.float32, -lim1, lim1)
    b1 = jax.random.uniform(k_b1, (hidden,), jnp.float32, -lim1, lim1)
    lim2 = 1.0 / (hidden ** 0.5)
    w2 = jax.random.uniform(k_w2, (hidden, 1), jnp.float32, -lim2, lim2)
    b2 = jax.random.uniform(k_b2, (1,), jnp.float32, -lim2, lim2)

    token_ids = jax.random.randint(k_tok, (batch, max_string_length), 0, max_index,
                                   dtype=jnp.int32)

    out = net_forward(token_ids, emb_table, w1, b1, w2, b2)
    out = jax.block_until_ready(out)

    # Reference: the unfused eval-mode forward pass in plain JAX (high-precision matmuls).
    hp = jax.lax.Precision.HIGHEST
    x_ref = jnp.take(emb_table, token_ids, axis=0).reshape(batch, d_in)
    ref = jax.nn.sigmoid(
        jnp.dot(jnp.dot(x_ref, w1, precision=hp) + b1, w2, precision=hp) + b2)

    assert out.shape == (batch, 1)
    assert jnp.allclose(out, ref, atol=1e-5), "mismatch vs reference"

    print("KERNEL_OK")
</pallas_src>

<mosaic_0001>
module attributes {stable_mosaic.version = 11 : i64} {
  func.func @fused_net_kernel(%arg0: i32, %arg1: memref<8x128xi32, #tpu.memory_space<vmem>>, %arg2: memref<32x8xf32, #tpu.memory_space<vmem>>, %arg3: memref<1x128xf32, #tpu.memory_space<vmem>>) attributes {dimension_semantics = [#tpu.dimension_semantics<parallel>], iteration_bounds = array<i64: 1>, scalar_prefetch = 0 : i64, scratch_operands = 0 : i64, tpu.core_type = #tpu.core_type<tc>, window_params = [{transform_indices = @transform_0, window_bounds = array<i64: 8, 128>}, {pipeline_mode = #tpu.pipeline_mode<synchronous>, transform_indices = @transform_1, window_bounds = array<i64: 32, 8>}, {transform_indices = @transform_2, window_bounds = array<i64: 1, 128>}]} {
    %c0 = arith.constant 0 : index
    %c0_0 = arith.constant 0 : index
    %0 = vector.load %arg2[%c0, %c0_0] : memref<32x8xf32, #tpu.memory_space<vmem>>, vector<32x8xf32>
    %1 = tpu.iota {dimensions = array<i32: 0>} : vector<32x1xi32>
    %c0_1 = arith.constant 0 : index
    %c0_2 = arith.constant 0 : index
    %2 = vector.load %arg1[%c0_1, %c0_2] : memref<8x128xi32, #tpu.memory_space<vmem>>, vector<1x128xi32>
    %3 = vector.broadcast %2 : vector<1x128xi32> to vector<32x128xi32>
    %4 = vector.broadcast %1 : vector<32x1xi32> to vector<32x128xi32>
    %5 = arith.cmpi eq, %3, %4 : vector<32x128xi32>
    %6 = vector.extract_strided_slice %0 {offsets = [0, 0], sizes = [32, 1], strides = [1, 1]} : vector<32x8xf32> to vector<32x1xf32>
    %cst = arith.constant 0.000000e+00 : f32
    %7 = vector.shape_cast %6 : vector<32x1xf32> to vector<32x1xf32>
    %8 = vector.broadcast %7 : vector<32x1xf32> to vector<32x128xf32>
    %9 = vector.broadcast %cst : f32 to vector<32x128xf32>
    %10 = arith.select %5, %8, %9 : vector<32x128xi1>, vector<32x128xf32>
    %c1 = arith.constant 1 : index
    %c0_3 = arith.constant 0 : index
    %11 = vector.load %arg1[%c1, %c0_3] : memref<8x128xi32, #tpu.memory_space<vmem>>, vector<1x128xi32>
    %12 = vector.broadcast %11 : vector<1x128xi32> to vector<32x128xi32>
    %13 = vector.broadcast %1 : vector<32x1xi32> to vector<32x128xi32>
    %14 = arith.cmpi eq, %12, %13 : vector<32x128xi32>
    %15 = vector.extract_strided_slice %0 {offsets = [0, 1], sizes = [32, 1], strides = [1, 1]} : vector<32x8xf32> to vector<32x1xf32>
    %cst_4 = arith.constant 0.000000e+00 : f32
    %16 = vector.shape_cast %15 : vector<32x1xf32> to vector<32x1xf32>
    %17 = vector.broadcast %16 : vector<32x1xf32> to vector<32x128xf32>
    %18 = vector.broadcast %cst_4 : f32 to vector<32x128xf32>
    %19 = arith.select %14, %17, %18 : vector<32x128xi1>, vector<32x128xf32>
    %20 = arith.addf %10, %19 : vector<32x128xf32>
    %c2 = arith.constant 2 : index
    %c0_5 = arith.constant 0 : index
    %21 = vector.load %arg1[%c2, %c0_5] : memref<8x128xi32, #tpu.memory_space<vmem>>, vector<1x128xi32>
    %22 = vector.broadcast %21 : vector<1x128xi32> to vector<32x128xi32>
    %23 = vector.broadcast %1 : vector<32x1xi32> to vector<32x128xi32>
    %24 = arith.cmpi eq, %22, %23 : vector<32x128xi32>
    %25 = vector.extract_strided_slice %0 {offsets = [0, 2], sizes = [32, 1], strides = [1, 1]} : vector<32x8xf32> to vector<32x1xf32>
    %cst_6 = arith.constant 0.000000e+00 : f32
    %26 = vector.shape_cast %25 : vector<32x1xf32> to vector<32x1xf32>
    %27 = vector.broadcast %26 : vector<32x1xf32> to vector<32x128xf32>
    %28 = vector.broadcast %cst_6 : f32 to vector<32x128xf32>
    %29 = arith.select %24, %27, %28 : vector<32x128xi1>, vector<32x128xf32>
    %30 = arith.addf %20, %29 : vector<32x128xf32>
    %c3 = arith.constant 3 : index
    %c0_7 = arith.constant 0 : index
    %31 = vector.load %arg1[%c3, %c0_7] : memref<8x128xi32, #tpu.memory_space<vmem>>, vector<1x128xi32>
    %32 = vector.broadcast %31 : vector<1x128xi32> to vector<32x128xi32>
    %33 = vector.broadcast %1 : vector<32x1xi32> to vector<32x128xi32>
    %34 = arith.cmpi eq, %32, %33 : vector<32x128xi32>
    %35 = vector.extract_strided_slice %0 {offsets = [0, 3], sizes = [32, 1], strides = [1, 1]} : vector<32x8xf32> to vector<32x1xf32>
    %cst_8 = arith.constant 0.000000e+00 : f32
    %36 = vector.shape_cast %35 : vector<32x1xf32> to vector<32x1xf32>
    %37 = vector.broadcast %36 : vector<32x1xf32> to vector<32x128xf32>
    %38 = vector.broadcast %cst_8 : f32 to vector<32x128xf32>
    %39 = arith.select %34, %37, %38 : vector<32x128xi1>, vector<32x128xf32>
    %40 = arith.addf %30, %39 : vector<32x128xf32>
    %c4 = arith.constant 4 : index
    %c0_9 = arith.constant 0 : index
    %41 = vector.load %arg1[%c4, %c0_9] : memref<8x128xi32, #tpu.memory_space<vmem>>, vector<1x128xi32>
    %42 = vector.broadcast %41 : vector<1x128xi32> to vector<32x128xi32>
    %43 = vector.broadcast %1 : vector<32x1xi32> to vector<32x128xi32>
    %44 = arith.cmpi eq, %42, %43 : vector<32x128xi32>
    %45 = vector.extract_strided_slice %0 {offsets = [0, 4], sizes = [32, 1], strides = [1, 1]} : vector<32x8xf32> to vector<32x1xf32>
    %cst_10 = arith.constant 0.000000e+00 : f32
    %46 = vector.shape_cast %45 : vector<32x1xf32> to vector<32x1xf32>
    %47 = vector.broadcast %46 : vector<32x1xf32> to vector<32x128xf32>
    %48 = vector.broadcast %cst_10 : f32 to vector<32x128xf32>
    %49 = arith.select %44, %47, %48 : vector<32x128xi1>, vector<32x128xf32>
    %50 = arith.addf %40, %49 : vector<32x128xf32>
    %c5 = arith.constant 5 : index
    %c0_11 = arith.constant 0 : index
    %51 = vector.load %arg1[%c5, %c0_11] : memref<8x128xi32, #tpu.memory_space<vmem>>, vector<1x128xi32>
    %52 = vector.broadcast %51 : vector<1x128xi32> to vector<32x128xi32>
    %53 = vector.broadcast %1 : vector<32x1xi32> to vector<32x128xi32>
    %54 = arith.cmpi eq, %52, %53 : vector<32x128xi32>
    %55 = vector.extract_strided_slice %0 {offsets = [0, 5], sizes = [32, 1], strides = [1, 1]} : vector<32x8xf32> to vector<32x1xf32>
    %cst_12 = arith.constant 0.000000e+00 : f32
    %56 = vector.shape_cast %55 : vector<32x1xf32> to vector<32x1xf32>
    %57 = vector.broadcast %56 : vector<32x1xf32> to vector<32x128xf32>
    %58 = vector.broadcast %cst_12 : f32 to vector<32x128xf32>
    %59 = arith.select %54, %57, %58 : vector<32x128xi1>, vector<32x128xf32>
    %60 = arith.addf %50, %59 : vector<32x128xf32>
    %c6 = arith.constant 6 : index
    %c0_13 = arith.constant 0 : index
    %61 = vector.load %arg1[%c6, %c0_13] : memref<8x128xi32, #tpu.memory_space<vmem>>, vector<1x128xi32>
    %62 = vector.broadcast %61 : vector<1x128xi32> to vector<32x128xi32>
    %63 = vector.broadcast %1 : vector<32x1xi32> to vector<32x128xi32>
    %64 = arith.cmpi eq, %62, %63 : vector<32x128xi32>
    %65 = vector.extract_strided_slice %0 {offsets = [0, 6], sizes = [32, 1], strides = [1, 1]} : vector<32x8xf32> to vector<32x1xf32>
    %cst_14 = arith.constant 0.000000e+00 : f32
    %66 = vector.shape_cast %65 : vector<32x1xf32> to vector<32x1xf32>
    %67 = vector.broadcast %66 : vector<32x1xf32> to vector<32x128xf32>
    %68 = vector.broadcast %cst_14 : f32 to vector<32x128xf32>
    %69 = arith.select %64, %67, %68 : vector<32x128xi1>, vector<32x128xf32>
    %70 = arith.addf %60, %69 : vector<32x128xf32>
    %c7 = arith.constant 7 : index
    %c0_15 = arith.constant 0 : index
    %71 = vector.load %arg1[%c7, %c0_15] : memref<8x128xi32, #tpu.memory_space<vmem>>, vector<1x128xi32>
    %72 = vector.broadcast %71 : vector<1x128xi32> to vector<32x128xi32>
    %73 = vector.broadcast %1 : vector<32x1xi32> to vector<32x128xi32>
    %74 = arith.cmpi eq, %72, %73 : vector<32x128xi32>
    %75 = vector.extract_strided_slice %0 {offsets = [0, 7], sizes = [32, 1], strides = [1, 1]} : vector<32x8xf32> to vector<32x1xf32>
    %cst_16 = arith.constant 0.000000e+00 : f32
    %76 = vector.shape_cast %75 : vector<32x1xf32> to vector<32x1xf32>
    %77 = vector.broadcast %76 : vector<32x1xf32> to vector<32x128xf32>
    %78 = vector.broadcast %cst_16 : f32 to vector<32x128xf32>
    %79 = arith.select %74, %77, %78 : vector<32x128xi1>, vector<32x128xf32>
    %80 = arith.addf %70, %79 : vector<32x128xf32>
    %cst_17 = arith.constant dense<0.000000e+00> : vector<128xf32>
    %81 = vector.multi_reduction <add>, %80, %cst_17 [0] : vector<32x128xf32> to vector<128xf32>
    %82 = vector.shape_cast %81 : vector<128xf32> to vector<1x128xf32>
    %83 = arith.negf %82 : vector<1x128xf32>
    %84 = math.exp %83 : vector<1x128xf32>
    %cst_18 = arith.constant 1.000000e+00 : f32
    %85 = vector.broadcast %cst_18 : f32 to vector<1x128xf32>
    %86 = arith.addf %85, %84 : vector<1x128xf32>
    %87 = arith.divf %85, %86 : vector<1x128xf32>
    %c0_19 = arith.constant 0 : index
    %c0_20 = arith.constant 0 : index
    %88 = vector.load %arg3[%c0_19, %c0_20] : memref<1x128xf32, #tpu.memory_space<vmem>>, vector<1x128xf32>
    tpu.vector_store %arg3[%c0_19, %c0_20], %87 {strides = array<i32>} : memref<1x128xf32, #tpu.memory_space<vmem>>, vector<1x128xf32>,
    return
  }
  func.func @transform_0(%arg0: i32) -> (i32, i32) {
    %c0_i32 = arith.constant 0 : i32
    %c0_i32_0 = arith.constant 0 : i32
    return %c0_i32, %arg0 : i32, i32
  }
  func.func @transform_1(%arg0: i32) -> (i32, i32) {
    %c0_i32 = arith.constant 0 : i32
    %c0_i32_0 = arith.constant 0 : i32
    %c0_i32_1 = arith.constant 0 : i32
    return %c0_i32, %c0_i32_0 : i32, i32
  }
  func.func @transform_2(%arg0: i32) -> (i32, i32) {
    %c0_i32 = arith.constant 0 : i32
    %c0_i32_0 = arith.constant 0 : i32
    return %c0_i32, %arg0 : i32, i32
  }
}

</mosaic_0001>

<bundles_post_ra>
// kernel: tpu_custom_call.1
= control target key start
LH: loop header
LB: loop body
LE: loop exit
PB: predicated region body
PF: predicated region fallthrough
CT: control target
= control target key end

     0   :  { %v384_v1 = vmov 1   ;;  %v385_v2 = vmov 0   ;;  %s610_s0 = inlined_call_operand.vmem [shape: s32[8,128], index: 0, kind: input, shape index: {}]   ;;  %s611_s1 = inlined_call_operand.vmem [shape: f32[32,8], index: 1, kind: input, shape index: {}]   ;;  %s612_s2 = inlined_call_operand.hbm [shape: f32[1,128], index: 2, kind: output, shape index: {}]  }
   0x1   :  { %v411_v0 = vld [vmem:[%s611_s1] sm:$0xff]  ;;  %334 = vset.pattern.permute.xlu1 %v384_v1  ;;  %333 = vset.pattern.permute.xlu0 %v385_v2  ;;  %v13_v3 = vld [vmem:[%s611_s1 + $0x8] sm:$0xff] }
   0x2   :  { %64 = vperm.xlu1 %334, %v411_v0   ;;  %32 = vperm.xlu0 %333, %v411_v0  }
   0x3   :  { %7 = vsyncpa [#allocation3], 0  ;;  %v14_v4 = vld [vmem:[%s611_s1 + $0x10] sm:$0xff]  ;;  %v386_v5 = vmov 2   ;;  %v15_v6 = vld [vmem:[%s611_s1 + $0x18] sm:$0xff]  ;;  %v387_v7 = vmov 3   ;;  %v16_v30 = vlaneseq }
   0x4   :  { %v388_v8 = vmov 4   ;;  %v389_v9 = vmov 5   ;;  %v390_v10 = vmov 6   ;;  %v391_v11 = vmov 7   ;;  %v316_v34 = vld [vmem:[%s610_s0 + $0x1] ss:$0 sm:$0xff] }
   0x5   :  { %v448_v33 = vshrl.u32 %v16_v30, 7  ;;  %v315_v35 = vld [vmem:[%s610_s0] ss:$0 sm:$0xff]  ;;  %v317_v39 = vld [vmem:[%s610_s0 + $0x2] ss:$0 sm:$0xff] }
   0x6   :  { %68 = vperm.xlu1 %334, %v13_v3   ;;  %37 = vperm.xlu0 %333, %v13_v3   ;;  %v479_v42 = vld [vmem:[%s610_s0 + $0x3] ss:$0 sm:$0xff]  ;;  %v484_v43 = vld [vmem:[%s610_s0 + $0x4] ss:$0 sm:$0xff]  ;;  %v320_v51 = vld [vmem:[%s610_s0 + $0x5] ss:$0 sm:$0xff] }
   0x7   :  { %v457_v36 = vadd.s32 8, %v448_v33  ;;  %v460_v37 = vadd.s32 16, %v448_v33  ;;  %v468_v40 = vadd.s32 24, %v448_v33  ;;  %vm59_vm0 = vcmp.eq.s32.totalorder %v316_v34, %v448_v33  ;;  %v516_v53 = vld [vmem:[%s610_s0 + $0x6] ss:$0 sm:$0xff] }
   0x8   :  { %vm26_vm1 = vcmp.eq.s32.totalorder %v315_v35, %v448_v33  ;;  %vm92_vm7 = vcmp.eq.s32.totalorder %v317_v39, %v448_v33  ;;  %vm125_vm12 = vcmp.eq.s32.totalorder %v479_v42, %v448_v33  ;;  %vm158_vm13 = vcmp.eq.s32.totalorder %v484_v43, %v448_v33 }
   0x9   :  { %vm60_vm2 = vcmp.eq.s32.totalorder %v316_v34, %v457_v36  ;;  %vm27_vm3 = vcmp.eq.s32.totalorder %v315_v35, %v457_v36  ;;  %vm61_vm4 = vcmp.eq.s32.totalorder %v316_v34, %v460_v37  ;;  %vm28_vm5 = vcmp.eq.s32.totalorder %v315_v35, %v460_v37 }
   0xa   :  { %72 = vperm.xlu1 %334, %v14_v4   ;;  %42 = vperm.xlu0 %333, %v14_v4   ;;  %vm93_vm6 = vcmp.eq.s32.totalorder %v317_v39, %v457_v36  ;;  %vm29_vm8 = vcmp.eq.s32.totalorder %v315_v35, %v468_v40  ;;  %vm62_vm9 = vcmp.eq.s32.totalorder %v316_v34, %v468_v40 }
   0xb   :  { %vm94_vm10 = vcmp.eq.s32.totalorder %v317_v39, %v460_v37  ;;  %vm126_vm11 = vcmp.eq.s32.totalorder %v479_v42, %v457_v36  ;;  %vm95_vm14 = vcmp.eq.s32.totalorder %v317_v39, %v468_v40  ;;  %vm127_vm15 = vcmp.eq.s32.totalorder %v479_v42, %v460_v37 }
   0xe   :  { %336 = vset.pattern.permute.xlu1 %v386_v5  ;;  %335 = vset.pattern.permute.xlu0 %v386_v5 }
   0xf   :  { %101 = vperm.xlu1 %336, %v13_v3   ;;  %97 = vperm.xlu0 %335, %v411_v0  }
  0x13   :  { %337 = vset.pattern.permute.xlu1 %v385_v2  ;;  %338 = vset.pattern.permute.xlu0 %v384_v1 }
  0x14   :  { %47 = vperm.xlu1 %337, %v15_v6   ;;  %76 = vperm.xlu0 %338, %v15_v6  }
  0x18   :  { %339 = vset.pattern.permute.xlu1 %v386_v5  ;;  %341 = vset.pattern.permute.xlu0 %v387_v7 }
  0x19   :  { %105 = vperm.xlu1 %339, %v14_v4   ;;  %134 = vperm.xlu0 %341, %v13_v3  }
  0x1d   :  { %340 = vset.pattern.permute.xlu1 %v387_v7  ;;  %344 = vset.pattern.permute.xlu0 %v388_v8 }
  0x1e   :  { %130 = vperm.xlu1 %340, %v411_v0   ;;  %163 = vperm.xlu0 %344, %v411_v0  }
  0x22   :  { %342 = vset.pattern.permute.xlu1 %v386_v5  ;;  %171 = vperm.xlu0 %344, %v14_v4  }
  0x23   :  { %109 = vperm.xlu1 %342, %v15_v6  }
  0x26   :  { %348 = vset.pattern.permute.xlu0 %v389_v9 }
  0x27   :  { %343 = vset.pattern.permute.xlu1 %v387_v7  ;;  %200 = vperm.xlu0 %348, %v13_v3  }
  0x28   :  { %138 = vperm.xlu1 %343, %v14_v4  }
  0x2b   :  { %351 = vset.pattern.permute.xlu0 %v390_v10 }
  0x2c   :  { %345 = vset.pattern.permute.xlu1 %v388_v8  ;;  %229 = vperm.xlu0 %351, %v411_v0  }
  0x2d   :  { %167 = vperm.xlu1 %345, %v13_v3  }
  0x30   :  { %237 = vperm.xlu0 %351, %v14_v4  }
  0x31   :  { %346 = vset.pattern.permute.xlu1 %v387_v7 }
  0x32   :  { %142 = vperm.xlu1 %346, %v15_v6  }
  0x34   :  { %355 = vset.pattern.permute.xlu0 %v391_v11 }
  0x35   :  { %266 = vperm.xlu0 %355, %v13_v3  }
  0x36   :  { %347 = vset.pattern.permute.xlu1 %v389_v9 }
  0x37   :  { %196 = vperm.xlu1 %347, %v411_v0  }
  0x39   :  { %274 = vperm.xlu0 %355, %v15_v6  }
  0x3b   :  { %349 = vset.pattern.permute.xlu1 %v388_v8 }
  0x3c   :  { %175 = vperm.xlu1 %349, %v15_v6  }
  0x40   :  { %350 = vset.pattern.permute.xlu1 %v389_v9 }
  0x41   :  { %204 = vperm.xlu1 %350, %v14_v4  }
  0x45   :  { %352 = vset.pattern.permute.xlu1 %v390_v10 }
  0x46   :  { %233 = vperm.xlu1 %352, %v13_v3  }
  0x4a   :  { %353 = vset.pattern.permute.xlu1 %v389_v9 }
  0x4b   :  { %208 = vperm.xlu1 %353, %v15_v6  }
  0x4f   :  { %354 = vset.pattern.permute.xlu1 %v391_v11 }
  0x50   :  { %262 = vperm.xlu1 %354, %v411_v0  }
  0x54   :  { %356 = vset.pattern.permute.xlu1 %v390_v10 }
  0x55   :  { %241 = vperm.xlu1 %356, %v15_v6  }
  0x59   :  { %357 = vset.pattern.permute.xlu1 %v391_v11  ;;  %v322_v11 = vld [vmem:[%s610_s0 + $0x7] ss:$0 sm:$0xff]  ;;  %s392_s0 = smov [#allocation2]  }
  0x5a   :  { %270 = vperm.xlu1 %357, %v14_v4   ;;  %s307_s4 = sshll.u32 %s392_s0, 4  ;;  %s308_s4 = int_to_ptr.vmem [resolvable:$true] %s307_s4 }
  0x5b   :  { %s362_s5 = scalar_lea.vmem %s308_s4, 16  ;;  %s366_s6 = scalar_lea.vmem %s308_s4, 32 }
  0x5c   :  { %p363_p0 = scmp.ne.s32.totalorder %s308_s4, %s362_s5  ;;  %p367_p1 = scmp.lt.s32.totalorder %s308_s4, %s308_s4 }
  0x5d   :  { %p368_p2 = scmp.lt.s32.totalorder %s366_s6, %s362_s5 }
  0x5f   :  { %p369_p3 = por %p368_p2, %p367_p1 }
  0x61   :  { %p370_p4 = pnand %p369_p3, %p363_p0 }
  0x7d   :  { %v65_v12 = vpop.permute.xlu1 %64  ;;  %v33_v18 = vpop.permute.xlu0 %32 }
  0x7e   :  { %v79_v44 = vsel %vm59_vm0, %v65_v12, 0.0  ;;  %v50_v45 = vsel %vm26_vm1, %v33_v18, 0.0  ;;  %vm160_vm0 = vcmp.eq.s32.totalorder %v484_v43, %v460_v37  ;;  %vm159_vm1 = vcmp.eq.s32.totalorder %v484_v43, %v457_v36 }
  0x7f   :  { %v83_v52 = vadd.f32 %v79_v44, %v50_v45 }
  0x81   :  { %v69_v13 = vpop.permute.xlu1 %68  ;;  %v38_v20 = vpop.permute.xlu0 %37 }
  0x82   :  { %v80_v48 = vsel %vm60_vm2, %v69_v13, 0.0  ;;  %v51_v49 = vsel %vm27_vm3, %v38_v20, 0.0  ;;  %vm192_vm2 = vcmp.eq.s32.totalorder %v320_v51, %v457_v36  ;;  %vm128_vm3 = vcmp.eq.s32.totalorder %v479_v42, %v468_v40 }
  0x83   :  { %v84_v58 = vadd.f32 %v80_v48, %v51_v49 }
  0x85   :  { %v73_v14 = vpop.permute.xlu1 %72  ;;  %v43_v22 = vpop.permute.xlu0 %42 }
  0x86   :  { %v81_v54 = vsel %vm61_vm4, %v73_v14, 0.0  ;;  %v52_v55 = vsel %vm28_vm5, %v43_v22, 0.0  ;;  %vm191_vm4 = vcmp.eq.s32.totalorder %v320_v51, %v448_v33  ;;  %vm224_vm5 = vcmp.eq.s32.totalorder %v516_v53, %v448_v33 }
  0x87   :  { %v85_v0 = vadd.f32 %v81_v54, %v52_v55 }
  0x8a   :  { %v102_v15 = vpop.permute.xlu1 %101  ;;  %v98_v24 = vpop.permute.xlu0 %97 }
  0x8b   :  { %v112_v50 = vsel %vm92_vm7, %v98_v24, 0.0  ;;  %v113_v56 = vsel %vm93_vm6, %v102_v15, 0.0  ;;  %vm161_vm6 = vcmp.eq.s32.totalorder %v484_v43, %v468_v40  ;;  %vm193_vm7 = vcmp.eq.s32.totalorder %v320_v51, %v460_v37 }
  0x8c   :  { %v116_v59 = vadd.f32 %v112_v50, %v83_v52  ;;  %v117_v1 = vadd.f32 %v113_v56, %v84_v58 }
  0x8f   :  { %v430_v16 = vpop.permute.xlu1 %47  ;;  %v440_v26 = vpop.permute.xlu0 %76 }
  0x90   :  { %v53_v2 = vsel %vm29_vm8, %v430_v16, 0.0  ;;  %v82_v4 = vsel %vm62_vm9, %v440_v26, 0.0  ;;  %vm226_vm8 = vcmp.eq.s32.totalorder %v516_v53, %v460_v37  ;;  %vm225_vm9 = vcmp.eq.s32.totalorder %v516_v53, %v457_v36 }
  0x91   :  { %v86_v14 = vadd.f32 %v82_v4, %v53_v2 }
  0x94   :  { %v432_v17 = vpop.permute.xlu1 %105  ;;  %v135_v29 = vpop.permute.xlu0 %134 }
  0x95   :  { %v114_v61 = vsel %vm94_vm10, %v432_v17, 0.0  ;;  %v146_v62 = vsel %vm126_vm11, %v135_v29, 0.0  ;;  %vm258_vm10 = vcmp.eq.s32.totalorder %v322_v11, %v457_v36  ;;  %vm194_vm11 = vcmp.eq.s32.totalorder %v320_v51, %v468_v40 }
  0x96   :  { %v118_v8 = vadd.f32 %v114_v61, %v85_v0  ;;  %v150_v9 = vadd.f32 %v146_v62, %v117_v1 }
  0x99   :  { %v131_v19 = vpop.permute.xlu1 %130  ;;  %v164_v31 = vpop.permute.xlu0 %163 }
  0x9a   :  { %v145_v57 = vsel %vm125_vm12, %v131_v19, 0.0  ;;  %v178_v5 = vsel %vm158_vm13, %v164_v31, 0.0  ;;  %vm257_vm12 = vcmp.eq.s32.totalorder %v322_v11, %v448_v33  ;;  %vm227_vm13 = vcmp.eq.s32.totalorder %v516_v53, %v468_v40 }
  0x9b   :  { %v149_v3 = vadd.f32 %v145_v57, %v116_v59 }
  0x9d   :  { %v462_v38 = vpop.permute.xlu0 %171  ;;  %v182_v15 = vadd.f32 %v178_v5, %v149_v3 }
  0x9e   :  { %v434_v21 = vpop.permute.xlu1 %109  ;;  %v180_v19 = vsel %vm160_vm0, %v462_v38, 0.0 }
  0x9f   :  { %v115_v12 = vsel %vm95_vm14, %v434_v21, 0.0  ;;  %vm260_vm14 = vcmp.eq.s32.totalorder %v322_v11, %v468_v40 }
  0xa0   :  { %v119_v22 = vadd.f32 %v115_v12, %v86_v14 }
  0xa2   :  { %v201_v46 = vpop.permute.xlu0 %200 }
  0xa3   :  { %v436_v23 = vpop.permute.xlu1 %138  ;;  %v212_v20 = vsel %vm192_vm2, %v201_v46, 0.0 }
  0xa4   :  { %v147_v6 = vsel %vm127_vm15, %v436_v23, 0.0  ;;  %vm259_vm15 = vcmp.eq.s32.totalorder %v322_v11, %v460_v37 }
  0xa5   :  { %v151_v16 = vadd.f32 %v147_v6, %v118_v8 }
  0xa7   :  { %v230_v60 = vpop.permute.xlu0 %229 }
  0xa8   :  { %v438_v25 = vpop.permute.xlu1 %167  ;;  %v244_v24 = vsel %vm224_vm5, %v230_v60, 0.0 }
  0xa9   :  { %v179_v7 = vsel %vm159_vm1, %v438_v25, 0.0 }
  0xaa   :  { %v183_v17 = vadd.f32 %v179_v7, %v150_v9 }
  0xab   :  { %v238_v10 = vpop.permute.xlu0 %237 }
  0xac   :  { %v216_v29 = vadd.f32 %v212_v20, %v183_v17 }
  0xad   :  { %v442_v27 = vpop.permute.xlu1 %142 }
  0xae   :  { %v148_v21 = vsel %vm128_vm3, %v442_v27, 0.0 }
  0xaf   :  { %v152_v30 = vadd.f32 %v148_v21, %v119_v22 }
  0xb0   :  { %v267_v31 = vpop.permute.xlu0 %266 }
  0xb1   :  { %v278_v43 = vsel %vm258_vm10, %v267_v31, 0.0 }
  0xb2   :  { %v444_v28 = vpop.permute.xlu1 %196 }
  0xb3   :  { %v211_v13 = vsel %vm191_vm4, %v444_v28, 0.0  ;;  %v184_v28 = vadd.f32 %v180_v19, %v151_v16 }
  0xb4   :  { %v215_v23 = vadd.f32 %v211_v13, %v182_v15 }
  0xb6   :  { %v248_v38 = vadd.f32 %v244_v24, %v215_v23 }
  0xb7   :  { %v446_v32 = vpop.permute.xlu1 %175 }
  0xb8   :  { %v181_v25 = vsel %vm161_vm6, %v446_v32, 0.0 }
  0xb9   :  { %v185_v32 = vadd.f32 %v181_v25, %v152_v30 }
  0xbc   :  { %v470_v41 = vpop.permute.xlu1 %204 }
  0xbd   :  { %v213_v26 = vsel %vm193_vm7, %v470_v41, 0.0  ;;  %v246_v41 = vsel %vm226_vm8, %v238_v10, 0.0 }
  0xbe   :  { %v217_v39 = vadd.f32 %v213_v26, %v184_v28 }
  0xc0   :  { %v250_v48 = vadd.f32 %v246_v41, %v217_v39 }
  0xc1   :  { %v234_v47 = vpop.permute.xlu1 %233 }
  0xc2   :  { %v245_v27 = vsel %vm225_vm9, %v234_v47, 0.0  ;;  %v275_v47 = vpop.permute.xlu0 %274 }
  0xc3   :  { %v249_v42 = vadd.f32 %v245_v27, %v216_v29  ;;  %v280_v52 = vsel %vm260_vm14, %v275_v47, 0.0 }
  0xc5   :  { %v282_v49 = vadd.f32 %v278_v43, %v249_v42 }
  0xc6   :  { %v209_v63 = vpop.permute.xlu1 %208 }
  0xc7   :  { %v214_v33 = vsel %vm194_vm11, %v209_v63, 0.0 }
  0xc8   :  { %v218_v45 = vadd.f32 %v214_v33, %v185_v32 }
  0xcb   :  { %v263_v18 = vpop.permute.xlu1 %262 }
  0xcc   :  { %v277_v34 = vsel %vm257_vm12, %v263_v18, 0.0 }
  0xcd   :  { %v281_v46 = vadd.f32 %v277_v34, %v248_v38 }
  0xcf   :  { %v285_v55 = vadd.f32 %v282_v49, %v281_v46 }
  0xd0   :  { %v242_v35 = vpop.permute.xlu1 %241 }
  0xd1   :  { %v247_v44 = vsel %vm227_vm13, %v242_v35, 0.0 }
  0xd2   :  { %v251_v50 = vadd.f32 %v247_v44, %v218_v45 }
  0xd4   :  { %v284_v56 = vadd.f32 %v280_v52, %v251_v50 }
  0xd5   :  { %v271_v51 = vpop.permute.xlu1 %270 }
  0xd6   :  { %v279_v54 = vsel %vm259_vm15, %v271_v51, 0.0 }
  0xd7   :  { %v283_v53 = vadd.f32 %v279_v54, %v250_v48 }
  0xd9   :  { %v286_v57 = vadd.f32 %v285_v55, %v283_v53 }
  0xdb   :  { %v287_v36 = vadd.f32 %v286_v57, %v284_v56 }
  0xdd   :  { %v288_v58 = vrot.slane %v287_v36, 4 }
  0xdf   :  { %v289_v59 = vadd.f32 %v288_v58, %v287_v36 }
  0xe1   :  { %v290_v60 = vrot.slane %v289_v59, 2 }
  0xe3   :  { %v291_v61 = vadd.f32 %v290_v60, %v289_v59 }
  0xe5   :  { %v292_v62 = vrot.slane %v291_v61, 1 }
  0xe7   :  { %v293_v40 = vadd.f32 %v292_v62, %v291_v61 }
  0xe9   :  { %v323_v63 = vmul.f32 -1.442695, %v293_v40 }
  0xeb   :  { %358 = vpow2.f32 %v323_v63 }
  0xf8   :  { %v359_v37 = vpop.eup %358 }
  0xf9   :  { %v297_v0 = vadd.f32 1.0, %v359_v37 }
  0xfb   :  { %360 = vrcp.f32 %v297_v0 }
 0x108   :  { %v361_v1 = vpop.eup %360 }
 0x109   :  { %300 = vst [vmem:[#allocation2] sm:$0x1] %v361_v1 }
 0x10a   :  { %373 = shalt.err (!%p370_p4)
}
 0x10b   :  { %310 = dma.vmem_to_hbm [thread:$0]  %s308_s4, 16, %s612_s2, [#allocation3]  }
 0x10c   :  { %382 = dma.done.wait [#allocation3], 16  }
 0x10d   :  { %383 = vsyncadd [#allocation3], 4294967280 }
 0x10e   :  { %314 = vsyncpa [#allocation3], 1 }

</bundles_post_ra>
